<compile_context>
chip_gen: v7x
topology: tpu7x:2x2x1
jax: 0.10.0
libtpu: 0.0.40
codegen_flags: <defaults>
</compile_context>

<pallas_src>
import math

import jax
import jax.numpy as jnp
from jax.experimental import pallas as pl
from jax.experimental.pallas import tpu as pltpu


def _make_pe1d_kernel(use_mxu: bool):
    """Kernel factory. `use_mxu` selects the MXU packing contraction (r > 1)."""

    if use_mxu:
        def kernel(pos_ref, coef_ref, phase_ref, out_ref):
            # pos_ref:   (T, r)  r consecutive positions per packed output row
            # coef_ref:  (r, W)  row j: inv_freq (repeated per sin/cos pair) on
            #                    lanes [j*2F, (j+1)*2F), zero elsewhere
            # phase_ref: (1, W)  0 on sin columns, pi/2 on cos columns
            # out_ref:   (T, W)  W = r*2F (multiple of 128 -> unmasked stores)
            # Block-diagonal coef => this matmul IS the packed outer product
            # pos x inv_freq; HIGHEST keeps pos at f32 accuracy on the MXU.
            angle = jax.lax.dot_general(
                pos_ref[...], coef_ref[...],
                dimension_numbers=(((1,), (0,)), ((), ())),
                preferred_element_type=jnp.float32,
                precision=jax.lax.Precision.HIGHEST,
            )
            # sin(x + 0) = sin(x) on even cols, sin(x + pi/2) = cos(x) on odd.
            out_ref[...] = jnp.sin(angle + phase_ref[...])
    else:
        def kernel(pos_ref, coef_ref, phase_ref, out_ref):
            # r == 1: one lane-broadcast + one VPU multiply per output vreg.
            angle = pos_ref[:, 0:1] * coef_ref[0:1, :]
            out_ref[...] = jnp.sin(angle + phase_ref[...])

    return kernel


def _round_up(x: int, m: int) -> int:
    return ((x + m - 1) // m) * m


# ~8 MiB of f32 per grid tile (double-buffered by the BlockSpec pipeline):
# large enough that the ~0.35 us per-grid-step overhead is <5% of the HBM
# writeback time on v5e/v6e/v7x, small enough that 2x(out + pos) plus the
# constant coef/phase tables stay well under the 32 MiB scoped-VMEM we request.
_TILE_BYTES = 8 * 1024 * 1024
_MAX_PACK = 16          # cap on positions packed per output row


def positional_encoding_1d(pos: jax.Array, num_channels: int,
                           *, max_tile_rows=None) -> jax.Array:
    """Equivalent of PositionalEncoding1D(num_channels)(pos) in PyTorch."""
    assert pos.ndim == 1, "pos must be 1-D"
    n = pos.shape[0]
    pos = pos.astype(jnp.float32)

    # Deterministic "buffer" setup (matches the PyTorch __init__).
    idx = jnp.arange(0, num_channels, 2, dtype=jnp.float32)
    inv_freq = 1.0 / (10000.0 ** (idx / num_channels))              # (F,)
    f = int(inv_freq.shape[0])
    two_f = 2 * f

    invf_rep = jnp.repeat(inv_freq, 2)                              # (2F,)
    phase = jnp.tile(jnp.array([0.0, jnp.pi / 2], jnp.float32), f)  # (2F,)

    # Lane-dense packing: r consecutive positions per packed output row so
    # that W = r*2F is a multiple of 128 (full-width unmasked stores).
    r = 128 // math.gcd(two_f, 128)
    if r > _MAX_PACK:
        # Rare widths (2F not a multiple of 8): partial packing, W <= 128.
        r = max(1, 128 // two_f)
    w = r * two_f

    # Block-diagonal coefficients: coef[j, j*2F:(j+1)*2F] = invf_rep, else 0.
    coef = jnp.kron(jnp.eye(r, dtype=jnp.float32), invf_rep[None, :])  # (r, W)
    phase_row = jnp.tile(phase, r)[None, :]                            # (1, W)

    # Row tiling: ~8 MiB per (out + pos) tile, multiple of 8 rows; also cap at
    # ceil(rows/2) so the "parallel" grid has >= 2 steps and can shard across
    # both v7x TensorCores.
    rows = pl.cdiv(n, r)
    tgt_rows = max(8, (_TILE_BYTES // ((w + r) * 4)) // 8 * 8)
    if max_tile_rows is not None:
        tgt_rows = min(tgt_rows, max(8, (max_tile_rows // 8) * 8))
    tile_rows = max(8, min(tgt_rows, _round_up(pl.cdiv(rows, 2), 8)))
    rows_pad = _round_up(rows, tile_rows)
    n_pad = rows_pad * r

    pos_packed = jnp.pad(pos, (0, n_pad - n)).reshape(rows_pad, r)

    out = pl.pallas_call(
        _make_pe1d_kernel(use_mxu=(r > 1)),
        out_shape=jax.ShapeDtypeStruct((rows_pad, w), jnp.float32),
        grid=(rows_pad // tile_rows,),
        in_specs=[
            pl.BlockSpec((tile_rows, r), lambda i: (i, 0)),
            pl.BlockSpec((r, w), lambda i: (0, 0)),
            pl.BlockSpec((1, w), lambda i: (0, 0)),
        ],
        out_specs=pl.BlockSpec((tile_rows, w), lambda i: (i, 0)),
        compiler_params=pltpu.CompilerParams(
            dimension_semantics=("parallel",),
            vmem_limit_bytes=32 * 1024 * 1024),
    )(pos_packed, coef, phase_row)

    # Undo packing / padding: (rows_pad, W) is a row-major view of (n_pad, 2F).
    return out.reshape(n_pad, two_f)[:n]


def _reference(pos: jax.Array, num_channels: int) -> jax.Array:
    """Pure-JAX reference mirroring the PyTorch forward."""
    idx = jnp.arange(0, num_channels, 2, dtype=jnp.float32)
    inv_freq = 1.0 / (10000.0 ** (idx / num_channels))
    sin_inp = jnp.einsum("i,j->ij", pos.astype(jnp.float32), inv_freq)
    emb = jnp.stack((jnp.sin(sin_inp), jnp.cos(sin_inp)), axis=-1)
    return emb.reshape(sin_inp.shape[0], -1)


if __name__ == "__main__":
    key = jax.random.PRNGKey(0)
    k1, k2, k3, k4 = jax.random.split(key, 4)

    # Case 1: small config, 2F = 32 -> lane-packed MXU path (r=4, W=128).
    pos1 = jax.random.uniform(k1, (8,), dtype=jnp.float32) * 10.0
    out1 = jax.block_until_ready(positional_encoding_1d(pos1, 32))
    assert out1.shape == (8, 32), out1.shape
    assert jnp.allclose(out1, _reference(pos1, 32), atol=1e-5, rtol=1e-5)

    # Case 2: wide channels (2F = 256, r = 1 broadcast path), length not a
    # multiple of 8 (exercises row padding) and a 2-step grid.
    pos2 = jax.random.uniform(k2, (37,), dtype=jnp.float32) * 10.0
    out2 = jax.block_until_ready(positional_encoding_1d(pos2, 256))
    assert out2.shape == (37, 256), out2.shape
    assert jnp.allclose(out2, _reference(pos2, 256), atol=1e-5, rtol=1e-5)

    # Case 3: multi-step "parallel" grid with small tiles (MXU path, r=4).
    pos3 = jax.random.uniform(k3, (600,), dtype=jnp.float32) * 10.0
    out3 = jax.block_until_ready(
        positional_encoding_1d(pos3, 32, max_tile_rows=64))
    assert out3.shape == (600, 32), out3.shape
    assert jnp.allclose(out3, _reference(pos3, 32), atol=1e-5, rtol=1e-5)

    # Case 4: 2F = 48 does not divide 128 -> generalized packing (r=8, W=384),
    # still fully lane-dense (no masked stores).
    pos4 = jax.random.uniform(k4, (100,), dtype=jnp.float32) * 10.0
    out4 = jax.block_until_ready(positional_encoding_1d(pos4, 48))
    assert out4.shape == (100, 48), out4.shape
    assert jnp.allclose(out4, _reference(pos4, 48), atol=1e-5, rtol=1e-5)

    print("KERNEL_OK")
</pallas_src>

<mosaic_0001>
module attributes {stable_mosaic.version = 11 : i64} {
  func.func @kernel(%arg0: i32, %arg1: memref<8x4xf32, #tpu.memory_space<vmem>>, %arg2: memref<4x128xf32, #tpu.memory_space<vmem>>, %arg3: memref<1x128xf32, #tpu.memory_space<vmem>>, %arg4: memref<8x128xf32, #tpu.memory_space<vmem>>) attributes {dimension_semantics = [#tpu.dimension_semantics<parallel>], iteration_bounds = array<i64: 1>, scalar_prefetch = 0 : i64, scratch_operands = 0 : i64, tpu.core_type = #tpu.core_type<tc>, window_params = [{transform_indices = @transform_0, window_bounds = array<i64: 8, 4>}, {pipeline_mode = #tpu.pipeline_mode<synchronous>, transform_indices = @transform_1, window_bounds = array<i64: 4, 128>}, {pipeline_mode = #tpu.pipeline_mode<synchronous>, transform_indices = @transform_2, window_bounds = array<i64: 1, 128>}, {transform_indices = @transform_3, window_bounds = array<i64: 8, 128>}]} {
    %c0 = arith.constant 0 : index
    %c0_0 = arith.constant 0 : index
    %0 = vector.load %arg1[%c0, %c0_0] : memref<8x4xf32, #tpu.memory_space<vmem>>, vector<8x4xf32>
    %c0_1 = arith.constant 0 : index
    %c0_2 = arith.constant 0 : index
    %1 = vector.load %arg2[%c0_1, %c0_2] : memref<4x128xf32, #tpu.memory_space<vmem>>, vector<4x128xf32>
    %cst = arith.constant dense<0.000000e+00> : vector<8x128xf32>
    %2 = tpu.matmul %0, %1, %cst {dimension_numbers = #tpu.dot_dimension_numbers<[1], [0], [0], [1], [0, 0, 1, 1], [], []>, precision = #tpu.contract_precision<fp32>} : vector<8x4xf32>, vector<4x128xf32>, vector<8x128xf32> -> vector<8x128xf32>
    %c0_3 = arith.constant 0 : index
    %c0_4 = arith.constant 0 : index
    %3 = vector.load %arg3[%c0_3, %c0_4] : memref<1x128xf32, #tpu.memory_space<vmem>>, vector<1x128xf32>
    %4 = vector.broadcast %3 : vector<1x128xf32> to vector<8x128xf32>
    %5 = arith.addf %2, %4 : vector<8x128xf32>
    %6 = math.sin %5 : vector<8x128xf32>
    %c0_5 = arith.constant 0 : index
    %c0_6 = arith.constant 0 : index
    %7 = vector.load %arg4[%c0_5, %c0_6] : memref<8x128xf32, #tpu.memory_space<vmem>>, vector<8x128xf32>
    tpu.vector_store %arg4[%c0_5, %c0_6], %6 {strides = array<i32>} : memref<8x128xf32, #tpu.memory_space<vmem>>, vector<8x128xf32>,
    return
  }
  func.func @transform_0(%arg0: i32) -> (i32, i32) {
    %c0_i32 = arith.constant 0 : i32
    %c0_i32_0 = arith.constant 0 : i32
    return %arg0, %c0_i32 : i32, i32
  }
  func.func @transform_1(%arg0: i32) -> (i32, i32) {
    %c0_i32 = arith.constant 0 : i32
    %c0_i32_0 = arith.constant 0 : i32
    %c0_i32_1 = arith.constant 0 : i32
    return %c0_i32, %c0_i32_0 : i32, i32
  }
  func.func @transform_2(%arg0: i32) -> (i32, i32) {
    %c0_i32 = arith.constant 0 : i32
    %c0_i32_0 = arith.constant 0 : i32
    %c0_i32_1 = arith.constant 0 : i32
    return %c0_i32, %c0_i32_0 : i32, i32
  }
  func.func @transform_3(%arg0: i32) -> (i32, i32) {
    %c0_i32 = arith.constant 0 : i32
    %c0_i32_0 = arith.constant 0 : i32
    return %arg0, %c0_i32 : i32, i32
  }
}

</mosaic_0001>

<bundles_post_ra>
// kernel: tpu_custom_call.1
= control target key start
LH: loop header
LB: loop body
LE: loop exit
PB: predicated region body
PF: predicated region fallthrough
CT: control target
= control target key end

     0   :  { %vm28_vm0 = vcmask 1043456   ;;  %v695_v2 = vmov 0.0   ;;  %vm696_vm1 = vmmov 0   ;;  %vm24_vm2 = vcmask 31744   ;;  %s772_s0 = inlined_call_operand.vmem [shape: f32[8,4], index: 0, kind: input, shape index: {}]   ;;  %s773_s1 = inlined_call_operand.vmem [shape: f32[4,128], index: 1, kind: input, shape index: {}]   ;;  %s774_s2 = inlined_call_operand.vmem [shape: f32[1,128], index: 2, kind: input, shape index: {}]   ;;  %s775_s3 = inlined_call_operand.hbm [shape: f32[8,128], index: 3, kind: output, shape index: {}]  }
   0x1   :  { %v16_v0 = vld [vmem:[%s773_s1] sm:$0xf]  ;;  %629 = vmatprep.subr.mxu0 %v695_v2  ;;  %631 = vmatprep.mubr.msk.f32.mxu0 %vm696_vm1, %v695_v2 }
   0x2   :  { %v15_v1 = vld [vmem:[%s772_s0] sm:$0xff]  ;;  %v30_v3 = vsel %vm28_vm0, %v16_v0, 0 }
   0x3   :  { %8 = vsyncpa [#allocation3], 0  ;;  %v33_v4 = vand.u32 4294901760, %v30_v3  ;;  %v26_v5 = vsel %vm24_vm2, %v15_v1, 0  ;;  %614 = vmatprep.subr.mxu1 %v695_v2  ;;  %616 = vmatprep.mubr.msk.f32.mxu1 %vm696_vm1, %v695_v2  ;;  %v597_v17 = vld [vmem:[%s774_s2] ss:$0 sm:$0xff] }
   0x4   :  { %v98_v6 = vand.u32 4294901760, %v26_v5  ;;  %v697_v33 = vmov 2102212464   ;;  %v698_v35 = vmov 920167782   ;;  %s703_s2 = smov [#allocation2]  }
   0x5   :  { %v110_v7 = vsub.f32 %v30_v3, %v33_v4  ;;  %630 = vmatpush3.msra.mxu0 %v33_v4  ;;  %615 = vmatpush3.msra.mxu1 %v33_v4  ;;  %v699_v39 = vmov 1326507024   ;;  %v700_v41 = vmov 683565275   ;;  %v701_v43 = vmov 2475754826  }
   0x6   :  { %v99_v8 = vsub.f32 %v26_v5, %v98_v6  ;;  %619 = vmatprep.subr.mxu1 %v695_v2  ;;  %634 = vmatprep.subr.mxu0 %v695_v2  ;;  %v702_v46 = vmov 2131351028   ;;  %s589_s16 = sshll.u32 %s703_s2, 4  ;;  %s590_s16 = int_to_ptr.vmem [resolvable:$true] %s589_s16 }
   0x7   :  { %v111_v9 = vand.u32 4294901760, %v110_v7  ;;  %s671_s17 = scalar_lea.vmem %s590_s16, 128  ;;  %p676_p1 = scmp.lt.s32.totalorder %s590_s16, %s590_s16 }
   0x8   :  { %v100_v10 = vand.u32 4294901760, %v99_v8  ;;  %p672_p0 = scmp.ne.s32.totalorder %s590_s16, %s671_s17  ;;  %p677_p2 = scmp.lt.s32.totalorder %s671_s17, %s671_s17 }
   0x9   :  { %v112_v11 = vsub.f32 %v110_v7, %v111_v9 }
   0xa   :  { %632 = vmatmul.mubr.f32.vlgmr.msra.gmra.mrb[0].mxu0 %v100_v10  ;;  %v101_v12 = vsub.f32 %v99_v8, %v100_v10  ;;  %p678_p3 = por %p677_p2, %p676_p1 }
   0xb   :  { %v113_v13 = vand.u32 4294901760, %v112_v11  ;;  %635 = vmatpush3.msra.mxu0 %v111_v9  ;;  %636 = vmatprep.mubr.msk.f32.mxu0 %vm696_vm1, %v695_v2 }
   0xc   :  { %v102_v14 = vand.u32 4294901760, %v101_v12  ;;  %639 = vmatprep.subr.mxu0 %v695_v2  ;;  %p679_p4 = pnand %p678_p3, %p672_p0 }
   0xe   :  { %617 = vmatmul.mubr.f32.vlgmr.msra.gmra.mrb[0].mxu1 %v102_v14 }
   0xf   :  { %620 = vmatpush3.msra.mxu1 %v113_v13  ;;  %621 = vmatprep.mubr.msk.f32.mxu1 %vm696_vm1, %v695_v2 }
  0x10   :  { %624 = vmatprep.subr.mxu1 %v695_v2 }
  0x12   :  { %637 = vmatmul.mubr.f32.vlgmr.msra.gmra.mrb[0].mxu0 %v98_v6 }
  0x13   :  { %640 = vmatpush3.msra.mxu0 %v33_v4  ;;  %641 = vmatprep.mubr.msk.f32.mxu0 %vm696_vm1, %v695_v2 }
  0x16   :  { %622 = vmatmul.mubr.f32.vlgmr.msra.gmra.mrb[0].mxu1 %v98_v6 }
  0x17   :  { %625 = vmatpush3.msra.mxu1 %v110_v7  ;;  %626 = vmatprep.mubr.msk.f32.mxu1 %vm696_vm1, %v695_v2 }
  0x1a   :  { %642 = vmatmul.mubr.f32.vlgmr.msra.gmra.mrb[0].mxu0 %v98_v6 }
  0x1e   :  { %627 = vmatmul.mubr.f32.vlgmr.msra.gmra.mrb[0].mxu1 %v99_v8 }
  0xed   :  { %v474_v15 = vpop.f32.mrb[0].mxu0 }
  0xee   :  { %v643_v16 = vpop.f32.mrb[1].mxu0 }
  0xf1   :  { %v254_v18 = vpop.f32.mrb[0].mxu1 }
  0xf2   :  { %v644_v19 = vadd.f32 %v597_v17, %v254_v18  ;;  %v628_v20 = vpop.f32.mrb[1].mxu1 }
  0xf4   :  { %v739_v21 = vadd.f32 %v644_v19, %v474_v15 }
  0xf6   :  { %v481_v22 = vand.u32 2139095040, %v739_v21  ;;  %v478_v23 = vand.u32 2147483647, %v739_v21  ;;  %vm480_vm10 = vcmp.lt.s32.totalorder %v739_v21, 0  ;;  %vm570_vm15 = vweird.f32 %v739_v21 }
  0xf8   :  { %v482_v24 = vshrl.u32 %v481_v22, 23  ;;  %v485_v26 = vand.u32 8388607, %v478_v23  ;;  %vm479_vm11 = vcmp.le.f32.partialorder %v478_v23, 0.7853982 }
  0xfa   :  { %v598_v25 = vadd.s32 4294967169, %v482_v24  ;;  %v486_v29 = vor.u32 8388608, %v485_v26 }
  0xfc   :  { %v488_v27 = vadd.s32 1, %v598_v25  ;;  %v526_v37 = vshll.u32 %v486_v29, 8 }
  0xfe   :  { %vm489_vm3 = vcmp.gt.s32.totalorder %v488_v27, 0 }
  0xff   :  { %v490_v28 = vsel %vm489_vm3, %v488_v27, 0 }
 0x100   :  { %v492_v30 = vand.u32 31, %v490_v28  ;;  %v491_v31 = vshrl.u32 %v490_v28, 5 }
 0x102   :  { %v493_v32 = vsub.s32 32, %v492_v30  ;;  %v504_v34 = vshll.u32 %v697_v33, %v492_v30  ;;  %v507_v36 = vshll.u32 %v698_v35, %v492_v30  ;;  %v495_v42 = vshll.u32 %v700_v41, %v492_v30 }
 0x103   :  { %v498_v45 = vshll.u32 %v701_v43, %v492_v30  ;;  %v501_v48 = vshll.u32 %v702_v46, %v492_v30  ;;  %vm513_vm4 = vcmp.lt.s32.totalorder %v491_v31, 4  ;;  %vm510_vm5 = vcmp.lt.s32.totalorder %v491_v31, 1 }
 0x104   :  { %v505_v38 = vshrl.u32 %v698_v35, %v493_v32  ;;  %v508_v40 = vshrl.u32 %v699_v39, %v493_v32  ;;  %v496_v44 = vshrl.u32 %v701_v43, %v493_v32  ;;  %v499_v47 = vshrl.u32 %v702_v46, %v493_v32 }
 0x105   :  { %v502_v49 = vshrl.u32 %v697_v33, %v493_v32  ;;  %v494_v53 = vshrl.u32 %v700_v41, %v493_v32  ;;  %vm511_vm6 = vcmp.lt.s32.totalorder %v491_v31, 2  ;;  %vm512_vm7 = vcmp.lt.s32.totalorder %v491_v31, 3 }
 0x106   :  { %v506_v50 = vor.u32 %v505_v38, %v504_v34  ;;  %v509_v51 = vor.u32 %v508_v40, %v507_v36  ;;  %v497_v52 = vor.u32 %v496_v44, %v495_v42  ;;  %v500_v54 = vor.u32 %v499_v47, %v498_v45 }
 0x107   :  { %v503_v55 = vor.u32 %v502_v49, %v501_v48 }
 0x108   :  { %v519_v56 = vsel %vm513_vm4, %v506_v50, 920167782  ;;  %v523_v57 = vsel %vm513_vm4, %v509_v51, 1326507024  ;;  %v518_v59 = vsel %vm510_vm5, %v497_v52, %v500_v54  ;;  %v514_v62 = vsel %vm510_vm5, %v494_v53, %v497_v52 }
 0x109   :  { %v515_v58 = vsel %vm513_vm4, %v503_v55, 2102212464  ;;  %v520_v60 = vsel %vm512_vm7, %v503_v55, %v519_v56  ;;  %v522_v61 = vsel %vm510_vm5, %v500_v54, %v503_v55  ;;  %v524_v1 = vsel %vm512_vm7, %v506_v50, %v523_v57 }
 0x10a   :  { %v516_v63 = vsel %vm512_vm7, %v500_v54, %v515_v58  ;;  %v521_v0 = vsel %vm511_vm6, %v518_v59, %v520_v60  ;;  %v525_v2 = vsel %vm511_vm6, %v522_v61, %v524_v1 }
 0x10b   :  { %v745_v3 = vmul.u32.u64.low %v526_v37, %v521_v0  ;;  %v746_v4 = vmul.u32.u64.high %v526_v37, %v521_v0, %v745_v3  ;;  %v748_v5 = vmul.u32.u64.low %v526_v37, %v525_v2  ;;  %v749_v6 = vmul.u32.u64.high %v526_v37, %v525_v2, %v748_v5 }
 0x10c   :  { %v517_v7 = vsel %vm511_vm6, %v514_v62, %v516_v63 }
 0x10d   :  { %v536_v8 = vadd.s32 1, %v746_v4  ;;  %v533_v9 = vmul.u32 %v526_v37, %v517_v7  ;;  %vm535_vm8 = vc.u32 %v749_v6, %v745_v3  ;;  %v534_v22 = vadd.s32 %v745_v3, %v749_v6 }
 0x10f   :  { %v537_v10 = vsel %vm535_vm8, %v536_v8, %v746_v4 }
 0x110   :  { %v538_v11 = vadd.s32 %v537_v10, %v533_v9 }
 0x112   :  { %v539_v12 = vadd.s32 536870912, %v538_v11 }
 0x114   :  { %v540_v13 = vshrl.u32 %v539_v12, 30 }
 0x116   :  { %v541_v14 = vshll.u32 %v540_v13, 30  ;;  %v564_v35 = vsub.s32 4, %v540_v13 }
 0x118   :  { %v542_v15 = vsub.s32 %v538_v11, %v541_v14  ;;  %v565_v38 = vsel %vm480_vm10, %v564_v35, %v540_v13 }
 0x119   :  { %v567_v40 = vsel %vm479_vm11, 0, %v565_v38 }
 0x11a   :  { %v544_v16 = vsub.s32 0, %v542_v15  ;;  %v571_v41 = vadd.s32 3, %v567_v40 }
 0x11c   :  { %v599_v17 = vmin.u32 %v544_v16, %v542_v15  ;;  %v572_v42 = vand.u32 3, %v571_v41 }
 0x11e   :  { %v546_v18 = vclz %v599_v17  ;;  %vm577_vm12 = vcmp.eq.s32.totalorder %v572_v42, 2  ;;  %vm574_vm13 = vcmp.eq.s32.totalorder %v572_v42, 0  ;;  %vm573_vm14 = vcmp.lt.s32.totalorder %v572_v42, 2 }
 0x120   :  { %v600_v19 = vadd.s32 4294967294, %v546_v18 }
 0x122   :  { %vm601_vm9 = vcmp.lt.s32.totalorder %v600_v19, 0 }
 0x123   :  { %v549_v20 = vsel %vm601_vm9, 0, %v600_v19 }
 0x124   :  { %v550_v24 = vsub.s32 32, %v549_v20  ;;  %v554_v25 = vsub.s32 4294967266, %v549_v20  ;;  %v551_v26 = vshll.u32 %v542_v15, %v549_v20 }
 0x126   :  { %v552_v27 = vshrl.u32 %v534_v22, %v550_v24  ;;  %v555_v28 = vadd.s32 127, %v554_v25 }
 0x128   :  { %v553_v29 = vor.u32 %v552_v27, %v551_v26  ;;  %v556_v30 = vshll.u32 %v555_v28, 23 }
 0x12a   :  { %v557_v31 = vor.u32 4788187, %v556_v30  ;;  %v560_v33 = vcvt.s32.f32 %v553_v29 }
 0x12c   :  { %v558_v32 = vand.u32 2147483647, %v557_v31 }
 0x12e   :  { %v561_v34 = vmul.f32 %v560_v33, %v558_v32 }
 0x130   :  { %v562_v36 = vxor.u32 2147483648, %v561_v34 }
 0x132   :  { %v563_v37 = vsel %vm480_vm10, %v562_v36, %v561_v34 }
 0x133   :  { %v566_v39 = vsel %vm479_vm11, %v739_v21, %v563_v37 }
 0x134   :  { %667 = vcosq.f32 %v566_v39 }
 0x135   :  { %669 = vsinq.f32 %v566_v39 }
 0x13e   :  { %v668_v43 = vpop.eup %667 }
 0x13f   :  { %v670_v44 = vpop.eup %669  ;;  %v578_v45 = vxor.u32 2147483648, %v668_v43 }
 0x140   :  { %v575_v46 = vxor.u32 2147483648, %v670_v44 }
 0x141   :  { %v579_v47 = vsel %vm577_vm12, %v578_v45, %v670_v44 }
 0x142   :  { %v576_v23 = vsel %vm574_vm13, %v668_v43, %v575_v46 }
 0x143   :  { %v580_v48 = vsel %vm573_vm14, %v576_v23, %v579_v47 }
 0x144   :  { %v581_v49 = vsel %vm570_vm15, nan, %v580_v48 }
 0x145   :  { %582 = vst [vmem:[#allocation2] sm:$0xff] %v581_v49 }
 0x146   :  { %682 = shalt.err (!%p679_p4)
}
 0x147   :  { %s683_s20 = scalar_lea.hbm %s775_s3, 128 }
 0x148   :  { %p684_p5 = scmp.ne.s32.totalorder %s775_s3, %s683_s20  ;;  %p687_p6 = scmp.lt.u32.totalorder %s683_s20, %s775_s3 }
 0x14a   :  { %p689_p7 = pnand %p687_p6, %p684_p5 }
 0x14c   :  { %692 = shalt.err (!%p689_p7)
}
 0x14d   :  { %592 = dma.vmem_to_hbm [thread:$0]  %s590_s16, 128, %s775_s3, [#allocation3]  }
 0x14e   :  { %693 = dma.done.wait [#allocation3], 128  }
 0x14f   :  { %694 = vsyncadd [#allocation3], 4294967168 }
 0x150   :  { %596 = vsyncpa [#allocation3], 1 }

</bundles_post_ra>
